<compile_context>
chip_gen: v6e
topology: v6e:2x2x1
jax: 0.10.0
libtpu: 0.0.40
codegen_flags: <defaults>
</compile_context>

<pallas_src>
import math

import jax
import jax.numpy as jnp
import numpy as np
from jax import lax
from jax.experimental import pallas as pl
from jax.experimental.pallas import tpu as pltpu


def _round_up(x, m):
    return ((x + m - 1) // m) * m


def _cdiv(a, b):
    return -(-a // b)


# -----------------------------------------------------------------------------
# Host side: fold stretch(s) + 'same' (2s+1)-tap conv + interleave into a banded
# matrix G so that   out_chunk = x_window @ G   runs on the MXU.
# For a nearest-stretched signal every output sample depends on only 3 original
# samples with phase-summed taps (PyTorch cross-correlation order):
#   out[q*s + p] = A[p]*x[q-1] + B[p]*x[q] + C[p]*x[q+1]
# G shape: (u+2, u*s) -- a window of u samples (+1 neighbour each side) produces
# u*s interleaved output samples.
# -----------------------------------------------------------------------------
def _stage_matrix_np(w, scale, u):
    s = int(scale)
    w = np.asarray(w, dtype=np.float64).reshape(-1)
    assert w.shape[0] == 2 * s + 1
    a = np.array([w[0:s - p].sum() for p in range(s)])           # coeff of x[q-1]
    b = np.array([w[s - p:2 * s - p].sum() for p in range(s)])   # coeff of x[q]
    cc = np.array([w[2 * s - p:2 * s + 1].sum() for p in range(s)])  # coeff of x[q+1]
    g = np.zeros((u + 2, u * s), dtype=np.float64)
    for q in range(u):
        cols = q * s + np.arange(s)
        g[q, cols] = a
        g[q + 1, cols] = b
        g[q + 2, cols] = cc
    return g.astype(np.float32)


def _split_hi_lo(g32):
    """Error-compensated bf16 split (hi + lo == f32 value to ~16 mantissa bits)."""
    g = jnp.asarray(g32, dtype=jnp.float32)
    hi = g.astype(jnp.bfloat16)
    lo = (g - hi.astype(jnp.float32)).astype(jnp.bfloat16)
    return hi, lo


# ------------------------------- Pallas kernel --------------------------------
def _make_kernel(scales, tt, widths, offs, pks, u_list, t_true):
    n = len(scales)
    out_w = tt * pks[n]
    base_q_last = -offs[n - 1] - 1     # read offset into v_{n-1} for output col 0

    def dot3(xs, gh, gl):
        # bf16_3x: (hi+lo) @ (hi+lo) minus the negligible lo@lo term, f32 accum.
        xs_hi = xs.astype(jnp.bfloat16)
        xs_lo = (xs - xs_hi.astype(jnp.float32)).astype(jnp.bfloat16)
        acc = jnp.dot(xs_hi, gh, preferred_element_type=jnp.float32)
        acc = acc + jnp.dot(xs_lo, gh, preferred_element_type=jnp.float32)
        acc = acc + jnp.dot(xs_hi, gl, preferred_element_type=jnp.float32)
        return acc

    def kernel(x_ref, *refs):
        g_refs = refs[:2 * n]
        o_ref = refs[2 * n]
        scratch = refs[2 * n + 1:]          # v_1 .. v_{n-1} working buffers
        j = pl.program_id(1)                # time-tile index

        def read_src(k, a, b):
            # slice [a, b) of stage-k input buffer v_k
            if k == 0:
                return x_ref[0, :, a:b]
            return scratch[k - 1][:, a:b]

        # ---- stages 0 .. n-2: stretch+conv+interleave fused into banded MXU
        # matmuls, chunk results stored at lane-aligned offsets in VMEM scratch.
        for k in range(n - 1):
            s = scales[k]
            u = u_list[k]
            m = widths[k] - 2
            gh, gl = g_refs[2 * k], g_refs[2 * k + 1]
            c = 0
            while c < m:
                uc = min(u, m - c)
                xs = read_src(k, c, c + uc + 2)
                res = dot3(xs, gh[0:uc + 2, 0:uc * s], gl[0:uc + 2, 0:uc * s])
                scratch[k][:, c * s:(c + uc) * s] = res
                c += uc

            # Each Conv2d zero-pads its OWN intermediate input, so zero the
            # buffer entries outside this stage's true signal range.  This is a
            # no-op on interior time tiles, so it is gated to edge tiles only.
            kk = k + 1
            base = j * (tt * pks[kk]) + offs[kk]
            limit = t_true * pks[kk]
            needs_mask = (base < 0) | (base + widths[kk] > limit)

            @pl.when(needs_mask)
            def _(kk=kk, base=base, limit=limit):
                gidx = lax.broadcasted_iota(jnp.int32, (1, widths[kk]), 1) + base
                keep = (gidx >= 0) & (gidx < limit)
                scratch[kk - 1][...] = jnp.where(keep, scratch[kk - 1][...], 0.0)

        # ---- final stage: compute only the owned output range and store the
        # chunks straight into o_ref at 128-aligned offsets (no concat / slice).
        k = n - 1
        s = scales[k]
        u = u_list[k]
        gh, gl = g_refs[2 * k], g_refs[2 * k + 1]
        c = 0
        while c < out_w:
            uc = min(u, (out_w - c) // s)
            a = base_q_last + c // s
            xs = read_src(k, a, a + uc + 2)
            res = dot3(xs, gh[0:uc + 2, 0:uc * s], gl[0:uc + 2, 0:uc * s])
            o_ref[:, c:c + uc * s] = res.astype(o_ref.dtype)
            c += uc * s

    return kernel


# -------------------------------- forward pass --------------------------------
def upsample_network_forward(c, weights, upsample_scales,
                             target_out_lanes=None, vmem_limit_bytes=None):
    """Pallas implementation of UpsampleNetwork.forward.

    c:       (B, C, T) float32
    weights: per-stage Conv2d(1,1,(1,2s+1),bias=False) taps, reshapeable to (2s+1,)
    returns: (B, C, T * prod(upsample_scales)) float32
    """
    b, ch, t = c.shape
    scales = [int(s) for s in upsample_scales]
    n = len(scales)
    if n == 0:
        return c.astype(jnp.float32)
    assert len(weights) == n

    pks = [1]
    for s in scales:
        pks.append(pks[-1] * s)
    prod = pks[-1]

    # Generation-specific budgets: v5e/v6e have 128 MiB physical VMEM, v7x 64 MiB.
    try:
        vmem_cap = int(pltpu.get_tpu_info().vmem_capacity_bytes)
    except Exception:  # pragma: no cover - conservative fallback
        vmem_cap = 64 * 1024 * 1024
    if vmem_limit_bytes is None:
        vmem_limit_bytes = min(vmem_cap * 3 // 4, 96 * 1024 * 1024)
    if target_out_lanes is None:
        target_out_lanes = 4096 if vmem_cap >= 96 * 1024 * 1024 else 2048

    # Left/right context (in input frames) so every stage's +/-1-sample
    # polyphase dependency resolves inside one time tile.
    halo = 0
    for s in reversed(scales):
        halo = _cdiv(halo, s) + 1

    # Input frames per time tile: output tile width tt*prod is a multiple of 128
    # (lane-dense, unmasked stores) except in the tiny single-tile case where we
    # use the exact signal length (block == full dim, no overhang).
    q = 128 // math.gcd(prod, 128)
    tt = max(q, ((target_out_lanes // prod) // q) * q)
    tt = max(tt, _round_up(halo, q))
    if tt >= t:
        tt = t
    n_t = _cdiv(t, tt)
    t_grid = n_t * tt
    out_w = tt * prod

    # Static per-stage working-buffer geometry (v_k widths / global offsets).
    widths = [tt + 2 * halo]
    offs = [-halo]
    for s in scales:
        widths.append((widths[-1] - 2) * s)
        offs.append((offs[-1] + 1) * s)

    # MXU chunk sizing: N = u*s is a multiple of 128 and >= 256 where useful
    # (fills the 256-wide MXU on v6e/v7x), capped at what a tile actually needs.
    u_list = []
    for k, s in enumerate(scales):
        u0 = 128 // math.gcd(s, 128)
        u_big = u0 * max(1, _cdiv(256, u0 * s))
        needed = (out_w // s) if k == n - 1 else max(1, widths[k] - 2)
        u_list.append(min(u_big, max(u0, _round_up(needed, u0))))

    # Banded stage matrices, split hi/lo for error-compensated bf16 matmuls.
    g_pairs = []
    for k, (w, s) in enumerate(zip(weights, scales)):
        g32 = _stage_matrix_np(np.asarray(w).reshape(-1), s, u_list[k])
        g_pairs.extend(_split_hi_lo(g32))

    # Row block sized against the per-generation VMEM budget; then rebalanced to
    # minimize padded (wasted) rows.
    rows = b * ch
    w0 = widths[0]
    per_row_bytes = 4 * (2 * w0 + 2 * out_w + sum(widths[1:n]))
    fixed_bytes = sum(int(g.size) * 2 * 2 for g in g_pairs)
    budget = int(vmem_limit_bytes * 0.6)
    row_blk = 256
    while row_blk > 8 and row_blk * per_row_bytes + fixed_bytes > budget:
        row_blk -= 8
    n_rb = _cdiv(rows, row_blk)
    row_blk = max(8, _round_up(_cdiv(rows, n_rb), 8))

    # Only the SMALL un-stretched input is rearranged in HBM: pad with halo /
    # tail zeros and gather overlapping per-tile windows (tt + 2*halo frames).
    x = c.reshape(rows, t).astype(jnp.float32)
    x = jnp.pad(x, ((0, 0), (halo, t_grid - t + halo)))
    win_idx = (np.arange(n_t) * tt)[:, None] + np.arange(w0)[None, :]
    x_win = jnp.transpose(x[:, win_idx], (1, 0, 2))          # (n_t, rows, w0)

    kernel = _make_kernel(scales, tt, widths, offs, pks, u_list, t)

    in_specs = [pl.BlockSpec((1, row_blk, w0), lambda i, j: (j, i, 0))]
    for g in g_pairs:
        in_specs.append(pl.BlockSpec(g.shape, lambda i, j: (0, 0)))

    scratch_shapes = [pltpu.VMEM((row_blk, widths[k]), jnp.float32)
                      for k in range(1, n)]

    out = pl.pallas_call(
        kernel,
        out_shape=jax.ShapeDtypeStruct((rows, t * prod), jnp.float32),
        grid=(n_rb, n_t),
        in_specs=in_specs,
        out_specs=pl.BlockSpec((row_blk, out_w), lambda i, j: (i, j)),
        scratch_shapes=scratch_shapes,
        compiler_params=pltpu.CompilerParams(
            dimension_semantics=("parallel", "parallel"),
            vmem_limit_bytes=int(vmem_limit_bytes)),
    )(x_win, *g_pairs)

    # TODO(synk): nonlinear_activation (!= None) and use_causal_conv=True
    # (different padding + crop) paths are not implemented (module defaults).
    return out.reshape(b, ch, t * prod)


# ------------------------------ pure-JAX reference -----------------------------
def upsample_network_reference(c, weights, upsample_scales):
    """Reference replicating the PyTorch NCHW semantics with lax conv."""
    x = c[:, None, :, :].astype(jnp.float32)                 # (B, 1, C, T)
    for scale, w in zip(upsample_scales, weights):
        x = jnp.repeat(x, scale, axis=-1)                    # nearest stretch
        kern = jnp.asarray(w).reshape(1, 1, 1, 2 * scale + 1)  # OIHW
        x = lax.conv_general_dilated(
            x, kern, window_strides=(1, 1),
            padding=((0, 0), (scale, scale)),
            dimension_numbers=("NCHW", "OIHW", "NCHW"),
            precision=lax.Precision.HIGHEST)
    return x[:, 0]


# ------------------------------------- main -------------------------------------
if __name__ == "__main__":
    key = jax.random.PRNGKey(0)

    def make_case(key, b, c_dim, t, scales):
        key, k_in = jax.random.split(key)
        cc = jax.random.normal(k_in, (b, c_dim, t), dtype=jnp.float32)
        ws = []
        for s in scales:
            key, k_w = jax.random.split(key)
            ws.append(jax.random.normal(k_w, (2 * s + 1,), jnp.float32) * 0.1)
        return key, cc, ws

    def check(cc, ws, scales, **kw):
        out = jax.block_until_ready(upsample_network_forward(cc, ws, scales, **kw))
        ref = jax.block_until_ready(upsample_network_reference(cc, ws, scales))
        assert out.shape == ref.shape, (out.shape, ref.shape)
        err = float(jnp.max(jnp.abs(out - ref)))
        # Kernel uses error-compensated bf16_3x MXU matmuls (~f32 accuracy).
        assert jnp.allclose(out, ref, rtol=2e-4, atol=5e-5), err

    # Case 1: small default-ish shape (B=2, C=4, T=8, scales [2, 2]).
    key, c1, w1 = make_case(key, 2, 4, 8, [2, 2])
    check(c1, w1, [2, 2])

    # Case 2: multiple time tiles + ragged time tail + ragged row block
    # (small target_out_lanes forces n_t > 1).
    key, c2, w2 = make_case(key, 1, 5, 50, [4, 4])
    check(c2, w2, [4, 4], target_out_lanes=256)

    # Case 3: three stages (two VMEM scratch buffers), mixed scales, odd T.
    key, c3, w3 = make_case(key, 1, 3, 37, [2, 4, 2])
    check(c3, w3, [2, 4, 2])

    print("KERNEL_OK")
</pallas_src>

<mosaic_0001>
module attributes {stable_mosaic.version = 11 : i64} {
  func.func @kernel(%arg0: i32, %arg1: i32, %arg2: memref<1x8x12xf32, #tpu.memory_space<vmem>>, %arg3: memref<66x128xbf16, #tpu.memory_space<vmem>>, %arg4: memref<66x128xbf16, #tpu.memory_space<vmem>>, %arg5: memref<66x128xbf16, #tpu.memory_space<vmem>>, %arg6: memref<66x128xbf16, #tpu.memory_space<vmem>>, %arg7: memref<8x32xf32, #tpu.memory_space<vmem>>, %arg8: memref<8x20xf32, #tpu.memory_space<vmem>>) attributes {dimension_semantics = [#tpu.dimension_semantics<parallel>, #tpu.dimension_semantics<parallel>], iteration_bounds = array<i64: 1, 1>, scalar_prefetch = 0 : i64, scratch_operands = 1 : i64, tpu.core_type = #tpu.core_type<tc>, window_params = [{transform_indices = @transform_0, window_bounds = array<i64: 1, 8, 12>}, {pipeline_mode = #tpu.pipeline_mode<synchronous>, transform_indices = @transform_1, window_bounds = array<i64: 66, 128>}, {pipeline_mode = #tpu.pipeline_mode<synchronous>, transform_indices = @transform_2, window_bounds = array<i64: 66, 128>}, {pipeline_mode = #tpu.pipeline_mode<synchronous>, transform_indices = @transform_3, window_bounds = array<i64: 66, 128>}, {pipeline_mode = #tpu.pipeline_mode<synchronous>, transform_indices = @transform_4, window_bounds = array<i64: 66, 128>}, {transform_indices = @transform_5, window_bounds = array<i64: 8, 32>}]} {
    %c0 = arith.constant 0 : index
    %c0_0 = arith.constant 0 : index
    %c0_1 = arith.constant 0 : index
    %0 = vector.load %arg2[%c0, %c0_0, %c0_1] : memref<1x8x12xf32, #tpu.memory_space<vmem>>, vector<1x8x12xf32>
    %1 = vector.shape_cast %0 : vector<1x8x12xf32> to vector<8x12xf32>
    %c0_2 = arith.constant 0 : index
    %c0_3 = arith.constant 0 : index
    %2 = vector.load %arg3[%c0_2, %c0_3] : memref<66x128xbf16, #tpu.memory_space<vmem>>, vector<12x20xbf16>
    %c0_4 = arith.constant 0 : index
    %c0_5 = arith.constant 0 : index
    %3 = vector.load %arg4[%c0_4, %c0_5] : memref<66x128xbf16, #tpu.memory_space<vmem>>, vector<12x20xbf16>
    %4 = arith.truncf %1 : vector<8x12xf32> to vector<8x12xbf16>
    %5 = arith.extf %4 : vector<8x12xbf16> to vector<8x12xf32>
    %6 = arith.subf %1, %5 : vector<8x12xf32>
    %7 = arith.truncf %6 : vector<8x12xf32> to vector<8x12xbf16>
    %cst = arith.constant dense<0.000000e+00> : vector<8x20xf32>
    %8 = tpu.matmul %4, %2, %cst {dimension_numbers = #tpu.dot_dimension_numbers<[1], [0], [0], [1], [0, 0, 1, 1], [], []>} : vector<8x12xbf16>, vector<12x20xbf16>, vector<8x20xf32> -> vector<8x20xf32>
    %cst_6 = arith.constant dense<0.000000e+00> : vector<8x20xf32>
    %9 = tpu.matmul %7, %2, %cst_6 {dimension_numbers = #tpu.dot_dimension_numbers<[1], [0], [0], [1], [0, 0, 1, 1], [], []>} : vector<8x12xbf16>, vector<12x20xbf16>, vector<8x20xf32> -> vector<8x20xf32>
    %10 = arith.addf %8, %9 : vector<8x20xf32>
    %cst_7 = arith.constant dense<0.000000e+00> : vector<8x20xf32>
    %11 = tpu.matmul %4, %3, %cst_7 {dimension_numbers = #tpu.dot_dimension_numbers<[1], [0], [0], [1], [0, 0, 1, 1], [], []>} : vector<8x12xbf16>, vector<12x20xbf16>, vector<8x20xf32> -> vector<8x20xf32>
    %12 = arith.addf %10, %11 : vector<8x20xf32>
    %c0_8 = arith.constant 0 : index
    %c0_9 = arith.constant 0 : index
    %13 = vector.load %arg8[%c0_8, %c0_9] : memref<8x20xf32, #tpu.memory_space<vmem>>, vector<8x20xf32>
    tpu.vector_store %arg8[%c0_8, %c0_9], %12 {strides = array<i32>} : memref<8x20xf32, #tpu.memory_space<vmem>>, vector<8x20xf32>,
    %c16_i32 = arith.constant 16 : i32
    %14 = arith.muli %arg1, %c16_i32 : i32
    %c-2_i32 = arith.constant -2 : i32
    %15 = arith.addi %14, %c-2_i32 : i32
    %c0_i32 = arith.constant 0 : i32
    %16 = arith.cmpi slt, %15, %c0_i32 : i32
    %c20_i32 = arith.constant 20 : i32
    %17 = arith.addi %15, %c20_i32 : i32
    %c16_i32_10 = arith.constant 16 : i32
    %18 = arith.cmpi sgt, %17, %c16_i32_10 : i32
    %19 = arith.ori %16, %18 : i1
    %20 = arith.extui %19 : i1 to i32
    %c0_i32_11 = arith.constant 0 : i32
    %21 = arith.cmpi ne, %20, %c0_i32_11 : i32
    scf.if %21 {
      %35 = tpu.iota {dimensions = array<i32: 1>} : vector<1x20xi32>
      %36 = vector.broadcast %15 : i32 to vector<1x20xi32>
      %37 = arith.addi %35, %36 : vector<1x20xi32>
      %c0_i32_22 = arith.constant 0 : i32
      %38 = vector.broadcast %c0_i32_22 : i32 to vector<1x20xi32>
      %39 = arith.cmpi sge, %37, %38 : vector<1x20xi32>
      %c16_i32_23 = arith.constant 16 : i32
      %40 = vector.broadcast %c16_i32_23 : i32 to vector<1x20xi32>
      %41 = arith.cmpi slt, %37, %40 : vector<1x20xi32>
      %42 = arith.andi %39, %41 : vector<1x20xi1>
      %c0_24 = arith.constant 0 : index
      %c0_25 = arith.constant 0 : index
      %43 = vector.load %arg8[%c0_24, %c0_25] : memref<8x20xf32, #tpu.memory_space<vmem>>, vector<8x20xf32>
      %cst_26 = arith.constant 0.000000e+00 : f32
      %44 = vector.shape_cast %42 : vector<1x20xi1> to vector<1x20xi1>
      %45 = vector.broadcast %44 : vector<1x20xi1> to vector<8x20xi1>
      %46 = vector.broadcast %cst_26 : f32 to vector<8x20xf32>
      %47 = arith.select %45, %43, %46 : vector<8x20xi1>, vector<8x20xf32>
      %c0_27 = arith.constant 0 : index
      %c0_28 = arith.constant 0 : index
      %48 = vector.load %arg8[%c0_27, %c0_28] : memref<8x20xf32, #tpu.memory_space<vmem>>, vector<8x20xf32>
      tpu.vector_store %arg8[%c0_27, %c0_28], %47 {strides = array<i32>} : memref<8x20xf32, #tpu.memory_space<vmem>>, vector<8x20xf32>,
    } else {
    }
    %c0_12 = arith.constant 0 : index
    %c1 = arith.constant 1 : index
    %22 = vector.load %arg8[%c0_12, %c1] : memref<8x20xf32, #tpu.memory_space<vmem>>, vector<8x18xf32>
    %c0_13 = arith.constant 0 : index
    %c0_14 = arith.constant 0 : index
    %23 = vector.load %arg5[%c0_13, %c0_14] : memref<66x128xbf16, #tpu.memory_space<vmem>>, vector<18x32xbf16>
    %c0_15 = arith.constant 0 : index
    %c0_16 = arith.constant 0 : index
    %24 = vector.load %arg6[%c0_15, %c0_16] : memref<66x128xbf16, #tpu.memory_space<vmem>>, vector<18x32xbf16>
    %25 = arith.truncf %22 : vector<8x18xf32> to vector<8x18xbf16>
    %26 = arith.extf %25 : vector<8x18xbf16> to vector<8x18xf32>
    %27 = arith.subf %22, %26 : vector<8x18xf32>
    %28 = arith.truncf %27 : vector<8x18xf32> to vector<8x18xbf16>
    %cst_17 = arith.constant dense<0.000000e+00> : vector<8x32xf32>
    %29 = tpu.matmul %25, %23, %cst_17 {dimension_numbers = #tpu.dot_dimension_numbers<[1], [0], [0], [1], [0, 0, 1, 1], [], []>} : vector<8x18xbf16>, vector<18x32xbf16>, vector<8x32xf32> -> vector<8x32xf32>
    %cst_18 = arith.constant dense<0.000000e+00> : vector<8x32xf32>
    %30 = tpu.matmul %28, %23, %cst_18 {dimension_numbers = #tpu.dot_dimension_numbers<[1], [0], [0], [1], [0, 0, 1, 1], [], []>} : vector<8x18xbf16>, vector<18x32xbf16>, vector<8x32xf32> -> vector<8x32xf32>
    %31 = arith.addf %29, %30 : vector<8x32xf32>
    %cst_19 = arith.constant dense<0.000000e+00> : vector<8x32xf32>
    %32 = tpu.matmul %25, %24, %cst_19 {dimension_numbers = #tpu.dot_dimension_numbers<[1], [0], [0], [1], [0, 0, 1, 1], [], []>} : vector<8x18xbf16>, vector<18x32xbf16>, vector<8x32xf32> -> vector<8x32xf32>
    %33 = arith.addf %31, %32 : vector<8x32xf32>
    %c0_20 = arith.constant 0 : index
    %c0_21 = arith.constant 0 : index
    %34 = vector.load %arg7[%c0_20, %c0_21] : memref<8x32xf32, #tpu.memory_space<vmem>>, vector<8x32xf32>
    tpu.vector_store %arg7[%c0_20, %c0_21], %33 {strides = array<i32>} : memref<8x32xf32, #tpu.memory_space<vmem>>, vector<8x32xf32>,
    return
  }
  func.func @transform_0(%arg0: i32, %arg1: i32) -> (i32, i32, i32) {
    %c0_i32 = arith.constant 0 : i32
    %c0_i32_0 = arith.constant 0 : i32
    return %arg1, %arg0, %c0_i32 : i32, i32, i32
  }
  func.func @transform_1(%arg0: i32, %arg1: i32) -> (i32, i32) {
    %c0_i32 = arith.constant 0 : i32
    %c0_i32_0 = arith.constant 0 : i32
    %c0_i32_1 = arith.constant 0 : i32
    return %c0_i32, %c0_i32_0 : i32, i32
  }
  func.func @transform_2(%arg0: i32, %arg1: i32) -> (i32, i32) {
    %c0_i32 = arith.constant 0 : i32
    %c0_i32_0 = arith.constant 0 : i32
    %c0_i32_1 = arith.constant 0 : i32
    return %c0_i32, %c0_i32_0 : i32, i32
  }
  func.func @transform_3(%arg0: i32, %arg1: i32) -> (i32, i32) {
    %c0_i32 = arith.constant 0 : i32
    %c0_i32_0 = arith.constant 0 : i32
    %c0_i32_1 = arith.constant 0 : i32
    return %c0_i32, %c0_i32_0 : i32, i32
  }
  func.func @transform_4(%arg0: i32, %arg1: i32) -> (i32, i32) {
    %c0_i32 = arith.constant 0 : i32
    %c0_i32_0 = arith.constant 0 : i32
    %c0_i32_1 = arith.constant 0 : i32
    return %c0_i32, %c0_i32_0 : i32, i32
  }
  func.func @transform_5(%arg0: i32, %arg1: i32) -> (i32, i32) {
    %c0_i32 = arith.constant 0 : i32
    return %arg0, %arg1 : i32, i32
  }
}

</mosaic_0001>

<bundles_post_ra>
// kernel: tpu_custom_call.1
= control target key start
LH: loop header
LB: loop body
LE: loop exit
PB: predicated region body
PF: predicated region fallthrough
CT: control target
= control target key end

     0   :  { %10 = vsyncpa [#allocation4], 0  ;;  %s762_s0 = inlined_call_operand.hbm [shape: f32[1,8,12], index: 0, kind: input, shape index: {}]   ;;  %s763_s1 = inlined_call_operand.hbm [shape: bf16[66,128], index: 1, kind: input, shape index: {}]   ;;  %s764_s2 = inlined_call_operand.hbm [shape: bf16[66,128], index: 2, kind: input, shape index: {}]   ;;  %s765_s3 = inlined_call_operand.hbm [shape: bf16[66,128], index: 3, kind: input, shape index: {}]   ;;  %s766_s4 = inlined_call_operand.hbm [shape: bf16[66,128], index: 4, kind: input, shape index: {}]   ;;  %s767_s5 = inlined_call_operand.hbm [shape: f32[8,32], index: 5, kind: output, shape index: {}]  }
   0x1   :  { %11 = vsyncpa [#allocation7], 0 }
   0x2   :  { %12 = vsyncpa [#allocation10], 0 }
   0x3   :  { %13 = vsyncpa [#allocation5], 0  ;;  %s668_s18 = smov [#allocation6]  }
   0x4   :  { %s29_s19 = sshll.u32 %s668_s18, 4  ;;  %s30_s19 = int_to_ptr.vmem [resolvable:$true] %s29_s19 }
   0x5   :  { %s548_s20 = scalar_lea.vmem %s30_s19, 576  ;;  %p553_p1 = scmp.lt.s32.totalorder %s30_s19, %s30_s19 }
   0x6   :  { %p549_p0 = scmp.ne.s32.totalorder %s30_s19, %s548_s20  ;;  %p554_p2 = scmp.lt.s32.totalorder %s548_s20, %s548_s20 }
   0x8   :  { %p555_p3 = por %p554_p2, %p553_p1 }
   0xa   :  { %p556_p4 = pnand %p555_p3, %p549_p0 }
   0xc   :  { %559 = shalt.err (!%p556_p4)
}
   0xd   :  { %s669_s21 = smov 64   ;;  %s670_s22 = smov 4  }
   0xe   :  { %35 = dma.hbm_to_vmem [thread:$0]  %s763_s1, 576, %s30_s19, [#allocation7], %s669_s21, %s669_s21, %s670_s22  }
   0xf   :  { %s671_s25 = smov [#allocation9]   ;;  %s672_s27 = smov [#allocation3]  }
  0x10   :  { %s53_s26 = sshll.u32 %s671_s25, 4  ;;  %s20_s28 = sshll.u32 %s672_s27, 4  ;;  %s54_s26 = int_to_ptr.vmem [resolvable:$true] %s53_s26  ;;  %s21_s28 = int_to_ptr.vmem [resolvable:$true] %s20_s28 }
  0x11   :  { %s568_s29 = scalar_lea.vmem %s54_s26, 576  ;;  %p573_p6 = scmp.lt.s32.totalorder %s54_s26, %s54_s26 }
  0x12   :  { %p569_p5 = scmp.ne.s32.totalorder %s54_s26, %s568_s29  ;;  %p574_p7 = scmp.lt.s32.totalorder %s568_s29, %s568_s29 }
  0x14   :  { %p575_p8 = por %p574_p7, %p573_p6 }
  0x16   :  { %p576_p9 = pnand %p575_p8, %p569_p5 }
  0x18   :  { %579 = shalt.err (!%p576_p9)
}
  0x19   :  { %59 = dma.hbm_to_vmem [thread:$0]  %s765_s3, 576, %s54_s26, [#allocation10], %s669_s21, %s669_s21, %s670_s22  }
  0x1a   :  { %s588_s1 = scalar_lea.vmem %s21_s28, 128  ;;  %p593_p11 = scmp.lt.s32.totalorder %s21_s28, %s21_s28 }
  0x1b   :  { %p589_p10 = scmp.ne.s32.totalorder %s21_s28, %s588_s1  ;;  %p594_p12 = scmp.lt.s32.totalorder %s588_s1, %s588_s1 }
  0x1d   :  { %p595_p13 = por %p594_p12, %p593_p11 }
  0x1f   :  { %p596_p0 = pnand %p595_p13, %p589_p10 }
  0x21   :  { %599 = shalt.err (!%p596_p0)
}
  0x22   :  { %23 = dma.hbm_to_vmem [thread:$0]  %s762_s0, 128, %s21_s28, [#allocation4]  }
  0x23   :  { %s673_s9 = smov [#allocation8]   ;;  %s674_s11 = smov [#allocation11]  }
  0x24   :  { %s41_s10 = sshll.u32 %s673_s9, 4  ;;  %s65_s12 = sshll.u32 %s674_s11, 4  ;;  %s42_s10 = int_to_ptr.vmem [resolvable:$true] %s41_s10  ;;  %s66_s12 = int_to_ptr.vmem [resolvable:$true] %s65_s12 }
  0x25   :  { %s608_s13 = scalar_lea.vmem %s42_s10, 576  ;;  %p613_p2 = scmp.lt.s32.totalorder %s42_s10, %s42_s10 }
  0x26   :  { %p609_p1 = scmp.ne.s32.totalorder %s42_s10, %s608_s13  ;;  %p614_p3 = scmp.lt.s32.totalorder %s608_s13, %s608_s13 }
  0x28   :  { %p615_p4 = por %p614_p3, %p613_p2 }
  0x2a   :  { %p616_p5 = pnand %p615_p4, %p609_p1 }
  0x2c   :  { %619 = shalt.err (!%p616_p5)
}
  0x2d   :  { %47 = dma.hbm_to_vmem [thread:$0]  %s764_s2, 576, %s42_s10, [#allocation7], %s669_s21, %s669_s21, %s670_s22  }
  0x2e   :  { %s628_s0 = scalar_lea.vmem %s66_s12, 576  ;;  %p633_p7 = scmp.lt.s32.totalorder %s66_s12, %s66_s12 }
  0x2f   :  { %p629_p6 = scmp.ne.s32.totalorder %s66_s12, %s628_s0  ;;  %p634_p8 = scmp.lt.s32.totalorder %s628_s0, %s628_s0 }
  0x31   :  { %p635_p9 = por %p634_p8, %p633_p7 }
  0x33   :  { %p636_p10 = pnand %p635_p9, %p629_p6 }
  0x35   :  { %639 = shalt.err (!%p636_p10)
}
  0x36   :  { %71 = dma.hbm_to_vmem [thread:$0]  %s766_s4, 576, %s66_s12, [#allocation10], %s669_s21, %s669_s21, %s670_s22  }
  0x37   :  { %660 = dma.done.wait [#allocation4], 128  }
  0x38   :  { %661 = vsyncadd [#allocation4], 4294967168 }
  0x39   :  { %662 = dma.done.wait [#allocation7], 1152  }
  0x3a   :  { %663 = vsyncadd [#allocation7], 4294966144 }
  0x3b   :  { %664 = dma.done.wait [#allocation10], 1152  }
  0x3c   :  { %665 = vsyncadd [#allocation10], 4294966144  ;;  %v675_v0 = vmov 0.0   ;;  %vm676_vm0 = vmmov 0   ;;  %vm106_vm1 = vcmask 1045504   ;;  %v88_v2 = vld [vmem:[#allocation3] sm:$0xff]  ;;  %v253_v17 = vlaneseq }
  0x3d   :  { %481 = vmatprep.subr.bf16.mxu0 %v675_v0  ;;  %487 = vmatprep.subr.bf16.mxu1 %v675_v0  ;;  %v534_v1 = vld [vmem:[#allocation6] sm:$0x3f]   ;;  %v93_v4 = vpack.c.bf16 %v88_v2, %v88_v2  ;;  %vm102_vm2 = vcmask 97280   ;;  %v536_v10 = vld [vmem:[#allocation9 + $0x8] ss:$0 sps:$4 sm:$0x11]  }
  0x3e   :  { %483 = vmatprep.mubr.msk.bf16.mxu0 %vm676_vm0, %v675_v0  ;;  %489 = vmatprep.mubr.msk.bf16.mxu1 %vm676_vm0, %v675_v0  ;;  %v108_v3 = vsel %vm106_vm1, %v534_v1, 0  ;;  %v535_v5 = vld [vmem:[#allocation8] sm:$0x3f]   ;;  %vm292_vm3 = vcmask 1040384   ;;  %v254_v21 = vand.u32 127, %v253_v17  ;;  %vm242_vm4 = vcmask 162816  }
  0x3f   :  { %482 = vmatpush3.bf16.msra.mxu0 %v108_v3  ;;  %488 = vmatpush3.bf16.msra.mxu1 %v108_v3  ;;  %v94_v6 = vunpack.c.l.bf16 %v93_v4  ;;  %v199_v8 = vsel %vm106_vm1, %v535_v5, 0  ;;  %v294_v11 = vsel %vm292_vm3, %v536_v10, 0  ;;  %v537_v12 = vld [vmem:[#allocation9] sm:$0xff]   ;;  %s677_s2 = smov 127   ;;  %vm288_vm8 = vcmask 146432   ;;  %s678_s4 = smov [#allocation12]  }
  0x40   :  { %493 = vmatprep.subr.bf16.mxu0 %v675_v0  ;;  %499 = vmatprep.subr.bf16.mxu1 %v675_v0  ;;  %v256_v26 = vadd.s32 4294967294, %v254_v21  ;;  %v538_v37 = vld [vmem:[#allocation11 + $0x8] ss:$0 sps:$4 sm:$0x11]   ;;  %v539_v40 = vld [vmem:[#allocation11] sm:$0xff]   ;;  %s443_s17 = sshll.u32 %s678_s4, 4  ;;  %s444_s17 = int_to_ptr.vmem [resolvable:$true] %s443_s17 }
  0x41   :  { %v95_v7 = vsub.f32 %v88_v2, %v94_v6  ;;  %v392_v38 = vsel %vm292_vm3, %v538_v37, 0  ;;  %vm435_vm9 = vcmask 261120   ;;  %s640_s18 = scalar_lea.vmem %s444_s17, 128  ;;  %p645_p12 = scmp.lt.s32.totalorder %s444_s17, %s444_s17 }
  0x42   :  { %490 = vmatmul.mubr.msk.bf16.vlgmr.msra.gmra.mxu1 %vm102_vm2, %v93_v4  ;;  %vm257_vm5 = vcmp.ge.s32.totalorder %v256_v26, 0  ;;  %vm258_vm6 = vcmp.lt.s32.totalorder %v256_v26, 16  ;;  %p641_p11 = scmp.ne.s32.totalorder %s444_s17, %s640_s18  ;;  %p646_p13 = scmp.lt.s32.totalorder %s640_s18, %s640_s18 }
  0x43   :  { %503 = vmatprep.mubr.msk.bf16.mxu1 %vm676_vm0, %v675_v0  ;;  %v96_v9 = vpack.c.bf16 %v95_v7, %v95_v7  ;;  %500 = vmatpush3.bf16.msra.mxu1 %v294_v11  ;;  %vm259_vm7 = vmand %vm257_vm5, %vm258_vm6 }
  0x44   :  { %501 = vmatprep.subr.bf16.mxu1 %v675_v0  ;;  %p647_p0 = por %p646_p13, %p645_p12 }
  0x45   :  { %484 = vmatmul.mubr.msk.bf16.vlgmr.msra.gmra.mxu0 %vm102_vm2, %v96_v9 }
  0x46   :  { %494 = vmatpush3.bf16.msra.mxu0 %v199_v8  ;;  %495 = vmatprep.mubr.msk.bf16.mxu0 %vm676_vm0, %v675_v0  ;;  %p648_p1 = pnand %p647_p0, %p641_p11 }
  0x47   :  { %507 = vmatprep.subr.bf16.mxu0 %v675_v0  ;;  %502 = vmatpush3.bf16.msra.mxu1 %v537_v12 }
  0x48   :  { %515 = vmatprep.subr.bf16.mxu1 %v675_v0 }
  0x4d   :  { %496 = vmatmul.mubr.msk.bf16.vlgmr.msra.gmra.mxu0 %vm102_vm2, %v93_v4 }
  0x4e   :  { %511 = vmatprep.mubr.msk.bf16.mxu0 %vm676_vm0, %v675_v0  ;;  %508 = vmatpush3.bf16.msra.mxu0 %v294_v11 }
  0x4f   :  { %509 = vmatprep.subr.bf16.mxu0 %v675_v0 }
  0x52   :  { %510 = vmatpush3.bf16.msra.mxu0 %v537_v12 }
 0x102   :  { %v187_v13 = vpop.f32.mrf.mxu1 }
 0x104   :  { %v491_v14 = vpop.f32.mrf.mxu1 }
 0x105   :  { %v144_v15 = vpop.f32.mrf.mxu0 }
 0x106   :  { %v190_v16 = vpop.f32.mrf.mxu1  ;;  %v188_v23 = vadd.f32 %v187_v13, %v144_v15 }
 0x107   :  { %v485_v18 = vpop.f32.mrf.mxu0 }
 0x108   :  { %v492_v19 = vpop.f32.mrf.mxu1 }
 0x109   :  { %v147_v20 = vpop.f32.mrf.mxu0 }
 0x10b   :  { %v486_v22 = vpop.f32.mrf.mxu0 }
 0x10d   :  { %v235_v24 = vpop.f32.mrf.mxu0 }
 0x10e   :  { %v241_v25 = vadd.f32 %v235_v24, %v188_v23 }
 0x10f   :  { %v497_v27 = vpop.f32.mrf.mxu0 }
 0x110   :  { %243 = vst.msk [vmem:[#allocation2] sm:$0xff] %vm242_vm4, %v241_v25 }
 0x111   :  { %v238_v28 = vpop.f32.mrf.mxu0 }
 0x113   :  { %v498_v29 = vpop.f32.mrf.mxu0 }
 0x117   :  { %v260_v30 = vld [vmem:[#allocation2] sm:$0xff] }
 0x118   :  { %v263_v31 = vsel %vm259_vm7, %v260_v30, 0.0 }
 0x119   :  { %264 = vst.msk [vmem:[#allocation2] sm:$0xff] %vm242_vm4, %v263_v31 }
 0x120   :  { %v265_v32 = vld [vmem:[#allocation2] sm:$0xff] }
 0x121   :  { %v272_v33 = vpack.c.bf16 %v265_v32, %v265_v32 }
 0x123   :  { %v273_v34 = vunpack.c.l.bf16 %v272_v33 }
 0x125   :  { %v274_v35 = vsub.f32 %v265_v32, %v273_v34 }
 0x127   :  { %v275_v36 = vpack.c.bf16 %v274_v35, %v274_v35 }
 0x129   :  { %277 = vrot.lane.b32.xlu0 %v275_v36, %s677_s2 }
 0x12d   :  { %337 = vrot.lane.b32.xlu0 %v272_v33, %s677_s2 }
 0x19b   :  { %v278_v39 = vpop.permute.xlu0 %277 }
 0x19c   :  { %504 = vmatmul.mubr.msk.bf16.vlgmr.msra.gmra.mxu1 %vm288_vm8, %v278_v39 }
 0x19d   :  { %516 = vmatpush3.bf16.msra.mxu1 %v392_v38  ;;  %519 = vmatprep.mubr.msk.bf16.mxu1 %vm676_vm0, %v675_v0 }
 0x19e   :  { %517 = vmatprep.subr.bf16.mxu1 %v675_v0 }
 0x19f   :  { %v338_v41 = vpop.permute.xlu0 %337 }
 0x1a0   :  { %512 = vmatmul.mubr.msk.bf16.vlgmr.msra.gmra.mxu0 %vm288_vm8, %v338_v41 }
 0x1a1   :  { %518 = vmatpush3.bf16.msra.mxu1 %v539_v40 }
 0x1a4   :  { %520 = vmatmul.mubr.msk.bf16.vlgmr.msra.gmra.mxu1 %vm288_vm8, %v338_v41 }
 0x25c   :  { %v330_v42 = vpop.f32.mrf.mxu1 }
 0x25e   :  { %v505_v43 = vpop.f32.mrf.mxu1 }
 0x260   :  { %v333_v44 = vpop.f32.mrf.mxu1  ;;  %v376_v45 = vpop.f32.mrf.mxu0 }
 0x261   :  { %v377_v48 = vadd.f32 %v376_v45, %v330_v42 }
 0x262   :  { %v506_v46 = vpop.f32.mrf.mxu1  ;;  %v513_v47 = vpop.f32.mrf.mxu0 }
 0x264   :  { %v379_v49 = vpop.f32.mrf.mxu0  ;;  %v428_v50 = vpop.f32.mrf.mxu1 }
 0x265   :  { %v434_v51 = vadd.f32 %v428_v50, %v377_v48 }
 0x266   :  { %v514_v52 = vpop.f32.mrf.mxu0  ;;  %v521_v53 = vpop.f32.mrf.mxu1 }
 0x267   :  { %436 = vst.msk [vmem:[#allocation12] sm:$0xff] %vm435_vm9, %v434_v51 }
 0x268   :  { %v431_v54 = vpop.f32.mrf.mxu1 }
 0x269   :  { %651 = shalt.err (!%p648_p1)
}
 0x26a   :  { %446 = dma.vmem_to_hbm [thread:$0]  %s444_s17, 128, %s767_s5, [#allocation5]   ;;  %v522_v55 = vpop.f32.mrf.mxu1 }
 0x26b   :  { %666 = dma.done.wait [#allocation5], 128  }
 0x26c   :  { %667 = vsyncadd [#allocation5], 4294967168 }
 0x26d   :  { %450 = vsyncpa [#allocation4], 1 }
 0x26e   :  { %451 = vsyncpa [#allocation7], 1 }
 0x26f   :  { %452 = vsyncpa [#allocation10], 1 }
 0x270   :  { %453 = vsyncpa [#allocation5], 1 }

</bundles_post_ra>
